<compile_context>
chip_gen: v7x
topology: tpu7x:2x2x1
jax: 0.10.0
libtpu: 0.0.40
codegen_flags: <defaults>
</compile_context>

<pallas_src>
import functools

import jax
import jax.numpy as jnp
from jax.experimental import pallas as pl
from jax.experimental.pallas import tpu as pltpu


# -----------------------------------------------------------------------------
# Kernels
# -----------------------------------------------------------------------------
def _avg_pool_kernel(tb_ref, sv_ref, ev_ref, x_ref, o_ref):
    # tb_ref: SMEM int32[(num_word_tiles,)]       batch index per word tile
    # sv_ref/ev_ref: VMEM (1, WT, 1) int32        span start/end per word in tile
    # x_ref:  VMEM (1, S, TH)                     hidden slab for this tile's batch
    # o_ref:  VMEM (WT, TH)                       pooled output tile
    x = x_ref[0]                                    # (S, TH)
    wt = o_ref.shape[0]
    seq_len = x.shape[0]

    st_col = sv_ref[0]                              # (WT, 1) int32
    en_col = ev_ref[0]                              # (WT, 1) int32

    # (WT, S) 0/1 membership mask -> MXU contraction against the (S, TH) slab.
    pos = jax.lax.broadcasted_iota(jnp.int32, (wt, seq_len), 1)
    mask = (pos >= st_col) & (pos < en_col)
    if x.dtype == jnp.bfloat16:
        weights = mask.astype(jnp.bfloat16)
        xs = x
    else:
        weights = mask.astype(jnp.float32)
        xs = x.astype(jnp.float32)
    sums = jnp.dot(weights, xs, preferred_element_type=jnp.float32)   # (WT, TH)

    cnt = jnp.maximum(en_col - st_col, 1).astype(jnp.float32)         # (WT, 1)
    # Exact divide kept for tight numerical match with mean();
    # pl.reciprocal(cnt, approx=True) is a free EUP alternative if ~1e-4
    # relative error is acceptable.
    o_ref[...] = (sums / cnt).astype(o_ref.dtype)


def _max_pool_kernel(tb_ref, s_ref, e_ref, x_ref, o_ref, *, window_len):
    # tb_ref: SMEM int32[(num_word_tiles,)]   batch index per word tile
    # s_ref/e_ref: SMEM int32[(W_pad,)]       span start/end per (padded) word
    # x_ref: VMEM (1, S, TH)                  hidden slab for this tile's batch
    # o_ref: VMEM (WT, TH)                    pooled output tile
    t = pl.program_id(1)                      # word-tile index (inner grid axis)
    wt = o_ref.shape[0]
    seq_len = x_ref.shape[1]
    base = t * wt

    # Compute in native dtype (bf16 max is order-preserving); only widen
    # exotic dtypes.
    cd = x_ref.dtype if x_ref.dtype in (jnp.bfloat16, jnp.float32) else jnp.float32
    neg = jnp.asarray(-jnp.inf, dtype=cd)

    rows = []
    for i in range(wt):                       # WT is static; unrolled at trace time
        st = s_ref[base + i]
        en = e_ref[base + i]
        if window_len < seq_len:
            # Bounded window: round the start down to a sublane multiple and
            # clamp so the window stays in-bounds (window_len and
            # seq_len - window_len are both multiples of 8 here).
            st8 = jnp.minimum((st // 8) * 8, seq_len - window_len)
            st8 = pl.multiple_of(st8, 8)
            win = x_ref[0, pl.ds(st8, window_len), :]          # (W_LEN, TH)
            pos = jax.lax.broadcasted_iota(jnp.int32, (window_len, 1), 0) + st8
        else:
            win = x_ref[0]                                      # (S, TH)
            pos = jax.lax.broadcasted_iota(jnp.int32, (seq_len, 1), 0)
        m = (pos >= st) & (pos < en)                            # (W, 1)
        rows.append(
            jnp.max(jnp.where(m, win.astype(cd), neg), axis=0, keepdims=True)
        )                                                       # (1, TH)
    o_ref[...] = jnp.concatenate(rows, axis=0).astype(o_ref.dtype)


# -----------------------------------------------------------------------------
# Host-side sizing helpers
# -----------------------------------------------------------------------------
def _vmem_capacity_bytes():
    try:
        return int(pltpu.get_tpu_info().vmem_capacity_bytes)
    except Exception:
        return 128 << 20


def _pick_h_tile(seq_len, hidden, itemsize, budget_bytes):
    """Largest H tile (dividing H, multiple of 128 when tiling) whose
    double-buffered (S, TH) input block fits the VMEM budget."""
    if hidden <= 128 or hidden % 128 != 0:
        # TODO(synk): pad H to a multiple of 128 on the host for huge, odd H.
        return hidden
    if 2 * seq_len * hidden * itemsize <= budget_bytes:
        return hidden
    best = 128                      # smallest legal tile is the safe fallback
    for th in range(128, hidden, 128):
        if hidden % th == 0 and 2 * seq_len * th * itemsize <= budget_bytes:
            best = th
    return best


# -----------------------------------------------------------------------------
# Public wrapper
# -----------------------------------------------------------------------------
def word_pooling(hidden_states, word_boundaries, pooling_type="average",
                 word_tile=32):
    """hidden_states: (B, S, H); word_boundaries: List[List[(start, end)]].

    Returns (total_words, H), rows ordered batch-major then span order,
    skipping empty spans — exactly like the PyTorch module.
    """
    if pooling_type not in ("average", "max"):
        raise ValueError("pooling_type must be 'average' or 'max'")
    B, S, H = hidden_states.shape

    # ---- host glue: flatten boundaries, drop empty spans, pad per batch so
    # every word tile lives entirely inside one batch element. ----------------
    tile_batch = []   # batch index per word tile
    starts, ends = [], []
    keep = []         # output-row indices of real (non-dummy) words
    max_win = 1       # max span length measured from an 8-aligned start
    for b, bounds in enumerate(word_boundaries):
        real = [(st, en) for (st, en) in bounds if en - st > 0]
        if not real:
            continue
        pad = (-len(real)) % word_tile
        for st, en in real:
            keep.append(len(starts))
            starts.append(st)
            ends.append(en)
            max_win = max(max_win, en - (st // 8) * 8)
        for _ in range(pad):
            starts.append(0)
            ends.append(1)        # dummy span; its output row is discarded
        tile_batch.extend([b] * ((len(real) + pad) // word_tile))

    W_pad = len(starts)
    if W_pad == 0:
        return jnp.zeros((0, H), dtype=hidden_states.dtype)
    num_word_tiles = W_pad // word_tile

    # Bounded window for the max branch (multiple of 8, only used if it both
    # shrinks the reduction and keeps the clamped start 8-aligned).
    window_len = min(-(-max_win // 8) * 8, S)
    if not (window_len < S and S % 8 == 0):
        window_len = S

    # ---- generation-aware VMEM sizing --------------------------------------
    itemsize = hidden_states.dtype.itemsize
    cap = _vmem_capacity_bytes()
    # ~24 MiB double-buffered-input budget on 64 MiB parts (v7x), ~48 MiB on
    # 128 MiB parts (v5e / v6e).
    input_budget = min(cap * 3 // 8, 96 << 20)
    th = _pick_h_tile(S, H, itemsize, input_budget)
    num_h_tiles = H // th if H % th == 0 else 1
    if num_h_tiles * th != H:   # safety: only tile H when it divides evenly
        th, num_h_tiles = H, 1

    in_block = S * th * itemsize
    out_block = word_tile * th * itemsize
    vmem_limit = 2 * (in_block + out_block) + (16 << 20)
    vmem_limit = int(min(max(vmem_limit, 32 << 20), cap - (8 << 20)))

    tb_arr = jnp.asarray(tile_batch, dtype=jnp.int32)

    # H axis "parallel" (v7x megacore splits H, keeping per-core input traffic
    # minimal), word-tile axis "arbitrary" so consecutive tiles of the same
    # batch element reuse the resident (S, TH) input block on one core.
    # TODO(synk): sweep pipeline_mode=pl.Buffered(3) on the input spec to hide
    # batch-boundary slab fetches when B is large.
    compiler_params = pltpu.CompilerParams(
        dimension_semantics=("parallel", "arbitrary"),
        vmem_limit_bytes=vmem_limit,
    )
    out_shape = jax.ShapeDtypeStruct((W_pad, H), hidden_states.dtype)

    if pooling_type == "average":
        s_v = jnp.asarray(starts, jnp.int32).reshape(num_word_tiles, word_tile, 1)
        e_v = jnp.asarray(ends, jnp.int32).reshape(num_word_tiles, word_tile, 1)
        out_padded = pl.pallas_call(
            _avg_pool_kernel,
            out_shape=out_shape,
            grid_spec=pltpu.PrefetchScalarGridSpec(
                num_scalar_prefetch=1,
                grid=(num_h_tiles, num_word_tiles),
                in_specs=[
                    pl.BlockSpec((1, word_tile, 1), lambda h, t, tb: (t, 0, 0)),
                    pl.BlockSpec((1, word_tile, 1), lambda h, t, tb: (t, 0, 0)),
                    pl.BlockSpec((1, S, th), lambda h, t, tb: (tb[t], 0, h)),
                ],
                out_specs=pl.BlockSpec((word_tile, th), lambda h, t, tb: (t, h)),
            ),
            compiler_params=compiler_params,
        )(tb_arr, s_v, e_v, hidden_states)
    else:  # max
        s_arr = jnp.asarray(starts, jnp.int32)
        e_arr = jnp.asarray(ends, jnp.int32)
        kernel = functools.partial(_max_pool_kernel, window_len=window_len)
        out_padded = pl.pallas_call(
            kernel,
            out_shape=out_shape,
            grid_spec=pltpu.PrefetchScalarGridSpec(
                num_scalar_prefetch=3,
                grid=(num_h_tiles, num_word_tiles),
                in_specs=[
                    pl.BlockSpec((1, S, th), lambda h, t, tb, s, e: (tb[t], 0, h)),
                ],
                out_specs=pl.BlockSpec((word_tile, th),
                                       lambda h, t, tb, s, e: (t, h)),
            ),
            compiler_params=compiler_params,
        )(tb_arr, s_arr, e_arr, hidden_states)

    if len(keep) == W_pad:
        return out_padded
    # TODO(synk): expose (out_padded, keep) so consumers can fuse this gather.
    return jnp.take(out_padded, jnp.asarray(keep, dtype=jnp.int32), axis=0)


# -----------------------------------------------------------------------------
# Pure-JAX reference
# -----------------------------------------------------------------------------
def _reference(hidden_states, word_boundaries, pooling_type):
    rows = []
    for b, bounds in enumerate(word_boundaries):
        for st, en in bounds:
            wv = hidden_states[b, st:en, :]
            if wv.shape[0] == 0:
                continue
            if pooling_type == "average":
                rows.append(jnp.mean(wv, axis=0))
            else:
                rows.append(jnp.max(wv, axis=0))
    if rows:
        return jnp.stack(rows, axis=0)
    return jnp.zeros((0, hidden_states.shape[-1]), dtype=hidden_states.dtype)


if __name__ == "__main__":
    # NOTE: WordPooling has no learnable parameters; nothing to initialize.
    ok = True

    # Test 1: tiny shapes, words spanning up to the full sequence
    # (exercises the full-S max path and the empty-span skip).
    B, S, H = 2, 16, 32
    hs1 = jax.random.normal(jax.random.PRNGKey(0), (B, S, H), dtype=jnp.float32)
    wb1 = [
        [(0, 3), (3, 5), (5, 16)],
        [(0, 1), (2, 2), (4, 10), (10, 16)],
    ]

    # Test 2: longer sequence with short words
    # (exercises the bounded-window max path and multiple word tiles).
    B2, S2, H2 = 2, 64, 128
    hs2 = jax.random.normal(jax.random.PRNGKey(1), (B2, S2, H2), dtype=jnp.float32)
    wb2 = [
        [(0, 4), (4, 9), (9, 14), (14, 20), (20, 27), (27, 33), (33, 40),
         (40, 47), (47, 55), (55, 64)],
        [(0, 2), (2, 7), (7, 7), (10, 16), (16, 25), (25, 30), (30, 38),
         (38, 45), (45, 52), (52, 60), (60, 64)],
    ]

    for hs, wb in ((hs1, wb1), (hs2, wb2)):
        for ptype in ("average", "max"):
            out = word_pooling(hs, wb, pooling_type=ptype)
            out = jax.block_until_ready(out)
            ref = _reference(hs, wb, ptype)
            if out.shape != ref.shape or not bool(
                jnp.allclose(out, ref, atol=1e-5, rtol=1e-5)
            ):
                ok = False
                print(f"MISMATCH pooling_type={ptype} input_shape={hs.shape}")

    if ok:
        print("KERNEL_OK")
</pallas_src>

<mosaic_0001>
module attributes {stable_mosaic.version = 11 : i64} {
  func.func @_avg_pool_kernel(%arg0: i32, %arg1: i32, %arg2: memref<2xi32, #tpu.memory_space<smem>>, %arg3: memref<1x32x1xi32, #tpu.memory_space<vmem>>, %arg4: memref<1x32x1xi32, #tpu.memory_space<vmem>>, %arg5: memref<1x16x32xf32, #tpu.memory_space<vmem>>, %arg6: memref<32x32xf32, #tpu.memory_space<vmem>>) attributes {dimension_semantics = [#tpu.dimension_semantics<parallel>, #tpu.dimension_semantics<arbitrary>], iteration_bounds = array<i64: 1, 2>, scalar_prefetch = 1 : i64, scratch_operands = 0 : i64, tpu.core_type = #tpu.core_type<tc>, window_params = [{transform_indices = @transform_0, window_bounds = array<i64: 1, 32, 1>}, {transform_indices = @transform_1, window_bounds = array<i64: 1, 32, 1>}, {transform_indices = @transform_2, window_bounds = array<i64: 1, 16, 32>}, {transform_indices = @transform_3, window_bounds = array<i64: 32, 32>}]} {
    %c0 = arith.constant 0 : index
    %c0_0 = arith.constant 0 : index
    %c0_1 = arith.constant 0 : index
    %0 = vector.load %arg5[%c0, %c0_0, %c0_1] : memref<1x16x32xf32, #tpu.memory_space<vmem>>, vector<1x16x32xf32>
    %1 = vector.shape_cast %0 : vector<1x16x32xf32> to vector<16x32xf32>
    %c0_2 = arith.constant 0 : index
    %c0_3 = arith.constant 0 : index
    %c0_4 = arith.constant 0 : index
    %2 = vector.load %arg3[%c0_2, %c0_3, %c0_4] : memref<1x32x1xi32, #tpu.memory_space<vmem>>, vector<1x32x1xi32>
    %3 = vector.shape_cast %2 : vector<1x32x1xi32> to vector<32x1xi32>
    %c0_5 = arith.constant 0 : index
    %c0_6 = arith.constant 0 : index
    %c0_7 = arith.constant 0 : index
    %4 = vector.load %arg4[%c0_5, %c0_6, %c0_7] : memref<1x32x1xi32, #tpu.memory_space<vmem>>, vector<1x32x1xi32>
    %5 = vector.shape_cast %4 : vector<1x32x1xi32> to vector<32x1xi32>
    %6 = tpu.iota {dimensions = array<i32: 1>} : vector<32x16xi32>
    %7 = vector.broadcast %3 : vector<32x1xi32> to vector<32x16xi32>
    %8 = arith.cmpi sge, %6, %7 : vector<32x16xi32>
    %9 = vector.broadcast %5 : vector<32x1xi32> to vector<32x16xi32>
    %10 = arith.cmpi slt, %6, %9 : vector<32x16xi32>
    %11 = arith.andi %8, %10 : vector<32x16xi1>
    %12 = arith.extui %11 : vector<32x16xi1> to vector<32x16xi32>
    %13 = arith.sitofp %12 : vector<32x16xi32> to vector<32x16xf32>
    %cst = arith.constant dense<0.000000e+00> : vector<32x32xf32>
    %14 = tpu.matmul %13, %1, %cst {dimension_numbers = #tpu.dot_dimension_numbers<[1], [0], [0], [1], [0, 0, 1, 1], [], []>} : vector<32x16xf32>, vector<16x32xf32>, vector<32x32xf32> -> vector<32x32xf32>
    %15 = arith.subi %5, %3 : vector<32x1xi32>
    %c1_i32 = arith.constant 1 : i32
    %16 = vector.broadcast %c1_i32 : i32 to vector<32x1xi32>
    %17 = arith.maxsi %15, %16 : vector<32x1xi32>
    %18 = arith.sitofp %17 : vector<32x1xi32> to vector<32x1xf32>
    %19 = vector.broadcast %18 : vector<32x1xf32> to vector<32x32xf32>
    %20 = arith.divf %14, %19 : vector<32x32xf32>
    %c0_8 = arith.constant 0 : index
    %c0_9 = arith.constant 0 : index
    %21 = vector.load %arg6[%c0_8, %c0_9] : memref<32x32xf32, #tpu.memory_space<vmem>>, vector<32x32xf32>
    tpu.vector_store %arg6[%c0_8, %c0_9], %20 {strides = array<i32>} : memref<32x32xf32, #tpu.memory_space<vmem>>, vector<32x32xf32>,
    return
  }
  func.func @transform_0(%arg0: i32, %arg1: i32, %arg2: memref<2xi32, #tpu.memory_space<smem>>) -> (i32, i32, i32) {
    %c0_i32 = arith.constant 0 : i32
    %c0_i32_0 = arith.constant 0 : i32
    %c0_i32_1 = arith.constant 0 : i32
    return %arg1, %c0_i32, %c0_i32_0 : i32, i32, i32
  }
  func.func @transform_1(%arg0: i32, %arg1: i32, %arg2: memref<2xi32, #tpu.memory_space<smem>>) -> (i32, i32, i32) {
    %c0_i32 = arith.constant 0 : i32
    %c0_i32_0 = arith.constant 0 : i32
    %c0_i32_1 = arith.constant 0 : i32
    return %arg1, %c0_i32, %c0_i32_0 : i32, i32, i32
  }
  func.func @transform_2(%arg0: i32, %arg1: i32, %arg2: memref<2xi32, #tpu.memory_space<smem>>) -> (i32, i32, i32) {
    %0 = arith.index_cast %arg1 : i32 to index
    %1 = memref.load %arg2[%0] : memref<2xi32, #tpu.memory_space<smem>>
    %c0_i32 = arith.constant 0 : i32
    %c0_i32_0 = arith.constant 0 : i32
    return %1, %c0_i32, %arg0 : i32, i32, i32
  }
  func.func @transform_3(%arg0: i32, %arg1: i32, %arg2: memref<2xi32, #tpu.memory_space<smem>>) -> (i32, i32) {
    %c0_i32 = arith.constant 0 : i32
    return %arg1, %arg0 : i32, i32
  }
}

</mosaic_0001>

<bundles_post_ra>
// kernel: tpu_custom_call.1
= control target key start
LH: loop header
LB: loop body
LE: loop exit
PB: predicated region body
PF: predicated region fallthrough
CT: control target
= control target key end

     0   :  { %s768_s0 = inlined_call_operand.vmem [shape: s32[2], index: 0, kind: input, shape index: {}]   ;;  %s769_s1 = inlined_call_operand.vmem [shape: s32[2,32,1], index: 1, kind: input, shape index: {}]   ;;  %s770_s2 = inlined_call_operand.vmem [shape: s32[2,32,1], index: 2, kind: input, shape index: {}]   ;;  %s771_s3 = inlined_call_operand.vmem [shape: f32[2,16,32], index: 3, kind: input, shape index: {}]   ;;  %s772_s4 = inlined_call_operand.vmem [shape: f32[64,32], index: 4, kind: output, shape index: {}]  }
   0x1   :  { %s9_s17 = sshll.u32 %s768_s0, 4  ;;  %s10_s17 = int_to_ptr.vmem [resolvable:$true] %s9_s17 }
   0x2   :  { %s650_s18 = scalar_lea.vmem %s10_s17, 16  ;;  %p655_p1 = scmp.lt.s32.totalorder %s10_s17, %s10_s17 }
   0x3   :  { %p651_p0 = scmp.ne.s32.totalorder %s10_s17, %s650_s18  ;;  %p656_p2 = scmp.lt.s32.totalorder %s650_s18, %s650_s18 }
   0x5   :  { %p657_p3 = por %p656_p2, %p655_p1 }
   0x7   :  { %p658_p4 = pnand %p657_p3, %p651_p0 }
   0x9   :  { %661 = shalt.err (!%p658_p4)  }
   0xa   :  { %s688_s19 = smov [#allocation3]  }
   0xb   :  { %12 = dma.vmem_to_smem %s10_s17, 16, %s688_s19, [#allocation2] }
   0xc   :  { %674 = dma.done.wait [#allocation2], 16 }
   0xd   :  { %675 = vsyncadd [#allocation2], 4294967280 }
   0xe   :  { %14 = sfence }
   0xf   :  { %s719_s20 = smov 0   ;;  %s721_s21 = smov 0  }
  0x10   :  { %s723_s22 = smov 0  }
  0x11 LB: > { %s29_s0 = sadd.s32 1, %s682_s21  ;;  %p569_p5 = scmp.ge.s32.totalorder %s686_s22, 1  ;;  %s686_s22 = sphi %s723_s22, %s20_s22   ;;  %s682_s21 = sphi %s721_s21, %s774_s21   ;;  %s678_s20 = sphi %s719_s20, %s773_s20  }
  0x12   : > { %p30_p6 = scmp.ge.s32.totalorder %s29_s0, 2  ;;  %p187_p7 = scmp.lt.s32.totalorder %s686_s22, 3 }
  0x14   : > { %s776_s0 = smov (%p30_p6, %s29_s0), 0  ;;  %p188_p8 = pnand %p569_p5, %p187_p7 }
  0x15   : > { %p228_p9 = scmp.lt.s32.totalorder (!%p188_p8), %s678_s20, 1  ;;  %s238_s23 = sld [smem:[#allocation3 + %s678_s20]] (!%p188_p8)  ;;  %v689_v0 = vmov (!%p188_p8), 0   ;;  %v267_v24 = vlaneseq (!%p188_p8)  ;;  %vm313_vm9 = vcmask (!%p188_p8), 130048   ;;  %v690_v30 = vmov (!%p188_p8), 0.0  }
  0x16   : > { %191 = sbr.rel (%p188_p8) target bundleno = 393 (0x189), region = 32  ;;  %641 = vset.pattern.permute.xlu1 (!%p188_p8), %v689_v0  ;;  %640 = vset.pattern.permute.xlu0 (!%p188_p8), %v689_v0  ;;  %s576_s10 = sshll.u32 (!%p188_p8), %s678_s20, 2 }
  0x17   : > { %v268_v27 = vand.u32 (!%p188_p8), 127, %v267_v24  ;;  %p249_p11 = scmp.lt.s32.totalorder (!%p188_p8), %s576_s10, 7 }
  0x1b   : > { %p239_p10 = scmp.lt.s32.totalorder (!%p188_p8), %s238_s23, 1 }
  0x1d   : > { %s229_s24 = scalar_select %p228_p9, %s678_s20, 1 }
  0x1e   : > { %s778_s23 = smov (!%p239_p10, %s238_s23), 1  ;;  %s780_s10 = smov (!%p249_p11, %s576_s10), 7 }
  0x1f   : > { %s588_s25 = sshll.u32 %s229_s24, 5  ;;  %s590_s6 = sshll.u32 %s778_s23, 4 }
  0x20   : > { %s232_s28 = scalar_lea.vmem %s769_s1, %s588_s25  ;;  %s237_s5 = scalar_lea.vmem %s770_s2, %s588_s25 }
  0x21   : > { %v260_v1 = vld [vmem:[%s232_s28 + $0x8] sm:$0xff]  ;;  %v259_v2 = vld [vmem:[%s232_s28] sm:$0xff]  ;;  %v265_v7 = vld [vmem:[%s237_s5 + $0x10] sm:$0xff]  ;;  %s246_s9 = scalar_lea.vmem %s771_s3, %s590_s6  ;;  %s577_s11 = sshll.u32 %s780_s10, 3 }
  0x22   : > { %273 = vperm.xlu1 %641, %v260_v1   ;;  %270 = vperm.xlu0 %640, %v259_v2   ;;  %v264_v3 = vld [vmem:[%s237_s5 + $0x8] sm:$0xff]  ;;  %v263_v4 = vld [vmem:[%s237_s5] sm:$0xff]  ;;  %v261_v8 = vld [vmem:[%s232_s28 + $0x10] sm:$0xff]  ;;  %s255_s14 = scalar_lea.vmem %s772_s4, %s577_s11 }
  0x23   : > { %v412_v5 = vsub.s32 %v264_v3, %v260_v1  ;;  %v411_v6 = vsub.s32 %v263_v4, %v259_v2  ;;  %v266_v9 = vld [vmem:[%s237_s5 + $0x18] sm:$0xff]  ;;  %v413_v10 = vsub.s32 %v265_v7, %v261_v8  ;;  %v257_v12 = vld [vmem:[%s246_s9] sm:$0xff]  ;;  %v258_v13 = vld [vmem:[%s246_s9 + $0x8] sm:$0xff] }
  0x24   : > { %v262_v11 = vld [vmem:[%s232_s28 + $0x18] sm:$0xff]  ;;  %v607_v15 = vpack.c.bf16 %v258_v13, %v257_v12 }
  0x25   : > { %vm417_vm0 = vcmp.gt.s32.totalorder %v412_v5, 1  ;;  %vm415_vm1 = vcmp.gt.s32.totalorder %v411_v6, 1  ;;  %v414_v14 = vsub.s32 %v266_v9, %v262_v11  ;;  %vm419_vm2 = vcmp.gt.s32.totalorder %v413_v10, 1 }
  0x26   : > { %289 = vperm.xlu1 %641, %v264_v3   ;;  %286 = vperm.xlu0 %640, %v263_v4   ;;  %v418_v16 = vsel %vm417_vm0, %v412_v5, 1  ;;  %v416_v17 = vsel %vm415_vm1, %v411_v6, 1  ;;  %v420_v21 = vsel %vm419_vm2, %v413_v10, 1  ;;  %vm455_vm1 = vcmask 261120  }
  0x27   : > { %608 = vmatprep.subr.bf16.mxu0 %v607_v15  ;;  %611 = vmatprep.subr.bf16.mxu1 %v607_v15  ;;  %vm421_vm3 = vcmp.gt.s32.totalorder %v414_v14, 1  ;;  %v424_v18 = vcvt.s32.f32 %v418_v16  ;;  %v423_v19 = vcvt.s32.f32 %v416_v17  ;;  %v425_v23 = vcvt.s32.f32 %v420_v21 }
  0x28   : > { %610 = vmatpush3.bf16.msra.mxu0 %v607_v15  ;;  %612 = vmatpush3.bf16.msra.mxu1 %v607_v15  ;;  %v422_v20 = vsel %vm421_vm3, %v414_v14, 1 }
  0x29   : > { %v426_v22 = vcvt.s32.f32 %v422_v20 }
  0x2a   : > { %292 = vperm.xlu1 %641, %v265_v7   ;;  %276 = vperm.xlu0 %640, %v261_v8  }
  0x2e   : > { %295 = vperm.xlu1 %641, %v266_v9   ;;  %279 = vperm.xlu0 %640, %v262_v11  }
  0x32   : > { %434 = vperm.xlu1 %641, %v424_v18   ;;  %429 = vperm.xlu0 %640, %v423_v19  }
  0x36   : > { %444 = vperm.xlu1 %641, %v426_v22   ;;  %439 = vperm.xlu0 %640, %v425_v23  }
  0xa1   : > { %v274_v25 = vpop.permute.xlu1 %273  ;;  %v271_v26 = vpop.permute.xlu0 %270 }
  0xa2   : > { %vm282_vm4 = vcmp.ge.s32.totalorder %v268_v27, %v274_v25  ;;  %vm281_vm7 = vcmp.ge.s32.totalorder %v268_v27, %v271_v26 }
  0xa5   : > { %v290_v28 = vpop.permute.xlu1 %289  ;;  %v287_v29 = vpop.permute.xlu0 %286 }
  0xa6   : > { %vm298_vm5 = vcmp.lt.s32.totalorder %v268_v27, %v290_v28  ;;  %vm297_vm6 = vcmp.lt.s32.totalorder %v268_v27, %v287_v29 }
  0xa7   : > { %vm302_vm8 = vmand %vm282_vm4, %vm298_vm5 }
  0xa8   : > { %v579_v31 = vsel %vm302_vm8, 1.0, %v690_v30  ;;  %vm301_vm10 = vmand %vm281_vm7, %vm297_vm6 }
  0xa9   : > { %v293_v32 = vpop.permute.xlu1 %292  ;;  %v578_v33 = vsel %vm301_vm10, 1.0, %v690_v30  ;;  %v277_v34 = vpop.permute.xlu0 %276 }
  0xaa   : > { %vm299_vm11 = vcmp.lt.s32.totalorder %v268_v27, %v293_v32  ;;  %601 = vmatprep.mubr.msk.f32.mxu0 %vm313_vm9, %v578_v33  ;;  %vm283_vm12 = vcmp.ge.s32.totalorder %v268_v27, %v277_v34 }
  0xab   : > { %602 = vmatmul.mubr.msk.f32.vlgmr.msra.gmra.mrb[0].mxu0 %vm313_vm9, %v579_v31  ;;  %vm303_vm13 = vmand %vm283_vm12, %vm299_vm11 }
  0xac   : > { %v580_v35 = vsel %vm303_vm13, 1.0, %v690_v30 }
  0xad   : > { %v296_v36 = vpop.permute.xlu1 %295  ;;  %604 = vmatprep.mubr.msk.f32.mxu1 %vm313_vm9, %v580_v35  ;;  %v280_v37 = vpop.permute.xlu0 %279 }
  0xae   : > { %vm300_vm14 = vcmp.lt.s32.totalorder %v268_v27, %v296_v36  ;;  %vm284_vm15 = vcmp.ge.s32.totalorder %v268_v27, %v280_v37 }
  0xaf   : > { %vm304_vm0 = vmand %vm284_vm15, %vm300_vm14 }
  0xb0   : > { %v581_v38 = vsel %vm304_vm0, 1.0, %v690_v30 }
  0xb1   : > { %605 = vmatmul.mubr.msk.f32.vlgmr.msra.gmra.mrb[0].mxu1 %vm313_vm9, %v581_v38  ;;  %v430_v39 = vpop.permute.xlu0 %429  ;;  %v435_v40 = vpop.permute.xlu1 %434 }
  0xb2   : > { %642 = vrcp.f32 %v430_v39 }
  0xb3   : > { %644 = vrcp.f32 %v435_v40 }
  0xb5   : > { %v440_v41 = vpop.permute.xlu0 %439  ;;  %v445_v42 = vpop.permute.xlu1 %444 }
  0xb6   : > { %646 = vrcp.f32 %v440_v41 }
  0xb7   : > { %648 = vrcp.f32 %v445_v42 }
  0xbc   : > { %v643_v44 = vpop.eup %642 }
  0xbd   : > { %v645_v46 = vpop.eup %644 }
  0xc0   : > { %v647_v50 = vpop.eup %646 }
  0xc1   : > { %v649_v52 = vpop.eup %648 }
 0x17e   : > { %v603_v43 = vpop.f32.mrb[0].mxu0 }
 0x17f   : > { %v392_v45 = vpop.f32.mrb[1].mxu0  ;;  %v450_v48 = vmul.f32 %v645_v46, %v603_v43 }
 0x180   : > { %v448_v47 = vmul.f32 %v643_v44, %v392_v45 }
 0x181   : > { %457 = vst.msk [vmem:[%s255_s14 + $0x8] sm:$0xff] %vm455_vm1, %v450_v48 }
 0x182   : > { %456 = vst.msk [vmem:[%s255_s14] sm:$0xff] %vm455_vm1, %v448_v47 }
 0x184   : > { %v606_v49 = vpop.f32.mrb[0].mxu1 }
 0x185   : > { %v402_v51 = vpop.f32.mrb[1].mxu1  ;;  %v454_v54 = vmul.f32 %v649_v52, %v606_v49 }
 0x186   : > { %v452_v53 = vmul.f32 %v647_v50, %v402_v51 }
 0x187   : > { %459 = vst.msk [vmem:[%s255_s14 + $0x18] sm:$0xff] %vm455_vm1, %v454_v54 }
 0x188   : > { %458 = vst.msk [vmem:[%s255_s14 + $0x10] sm:$0xff] %vm455_vm1, %v452_v53 }
 0x189 PF: > { %s20_s22 = sadd.s32 1, %s686_s22   ;;  %s773_s20 = smov %s682_s21 }
 0x18a   : > { %p17_p12 = scmp.ge.s32.totalorder %s20_s22, 4   ;;  %s774_s21 = smov %s776_s0 }
 0x18c   :  { %19 = sbr.rel (!%p17_p12) target bundleno = 17 (0x11), region = 68 }

</bundles_post_ra>
